<compile_context>
chip_gen: v7x
topology: tpu7x:2x2x1
jax: 0.10.0
libtpu: 0.0.40
codegen_flags: <defaults>
</compile_context>

<pallas_src>
import jax
import jax.numpy as jnp
from jax import lax
from jax.experimental import pallas as pl
from jax.experimental.pallas import tpu as pltpu

BN_EPS = 1e-5
LRELU_SLOPE = 0.2
KH = KW = 4
STRIDE = 2
PAD = 1
LANE = 128


def _cdiv(a, b):
    return -(-a // b)


def _round_up(x, m):
    return _cdiv(x, m) * m


def _vmem_capacity_bytes():
    """Physical VMEM of the local chip; conservative (v7x) fallback if unknown."""
    try:
        return int(pltpu.get_tpu_info().vmem_capacity_bytes)
    except Exception:
        return 64 * 1024 * 1024


# ---------------------------------------------------------------------------
# Pass 1: fused space-to-depth conv GEMM (bf16 x bf16 -> f32) + BN partials.
# ---------------------------------------------------------------------------
def _conv_stats_kernel(lo_ref, hi_ref, w_ref, y_ref, part_ref):
    # lo_ref/hi_ref: (TR, OW+1, 4*Cin) bf16 -- 2x2 space-to-depth'ed padded input,
    #                row-shifted by 0 / 2 (i.e. conv taps kh in {0,1} / {2,3}).
    # w_ref:         (4, 4*Cin, Coutp) bf16 -- macro-tap t = 2*dh + dw.
    # y_ref:         (TR, OW, Coutp) bf16   -- pre-norm conv output tile.
    # part_ref:      (1, 2, Coutp) f32      -- per-tile (sum, sum_sq).
    tr, owp1, c4 = lo_ref.shape
    ow = owp1 - 1
    coutp = w_ref.shape[-1]
    m = tr * ow

    acc = jnp.dot(lo_ref[:, 0:ow, :].reshape(m, c4), w_ref[0],
                  preferred_element_type=jnp.float32)
    acc += jnp.dot(lo_ref[:, 1:owp1, :].reshape(m, c4), w_ref[1],
                   preferred_element_type=jnp.float32)
    acc += jnp.dot(hi_ref[:, 0:ow, :].reshape(m, c4), w_ref[2],
                   preferred_element_type=jnp.float32)
    acc += jnp.dot(hi_ref[:, 1:owp1, :].reshape(m, c4), w_ref[3],
                   preferred_element_type=jnp.float32)

    # BN partial sums from the f32 accumulator (before the bf16 cast).
    # Zero-padded rows/channels contribute exactly zero.
    s = jnp.sum(acc, axis=0, keepdims=True)          # (1, Coutp)
    ss = jnp.sum(acc * acc, axis=0, keepdims=True)   # (1, Coutp)
    part_ref[...] = jnp.concatenate([s, ss], axis=0).reshape(1, 2, coutp)

    y_ref[...] = acc.reshape(tr, ow, coutp).astype(y_ref.dtype)


# ---------------------------------------------------------------------------
# Pass 2: global-stat BN affine + LeakyReLU (memory-bound epilogue).
# ---------------------------------------------------------------------------
def _bn_lrelu_kernel(y_ref, scale_ref, shift_ref, o_ref):
    z = y_ref[...].astype(jnp.float32) * scale_ref[...] + shift_ref[...]
    o_ref[...] = jnp.where(z > 0, z, LRELU_SLOPE * z).astype(o_ref.dtype)


def _space_to_depth_rows(xp, n, oh, ow, cin, row0):
    """(N, H+2, W+2, Cin) -> (N*OH, OW+1, 4*Cin) for rows row0..row0+2*OH-1.
    Last-axis channel order is (ph, pw, ci)."""
    blk = xp[:, row0:row0 + 2 * oh, :, :]
    blk = blk.reshape(n, oh, 2, ow + 1, 2, cin)
    blk = jnp.transpose(blk, (0, 1, 3, 2, 4, 5))     # (n, a, b, ph, pw, ci)
    return blk.reshape(n * oh, ow + 1, 4 * cin)


def _pick_tiles(rows, ow, c4, coutp):
    cap = _vmem_capacity_bytes()
    vmem_limit = min((cap * 3) // 4, 100 * 1024 * 1024)   # ~48 MiB v7x, ~96 MiB v5e/v6e
    budget = int(vmem_limit * 0.55)                       # headroom for compiler scratch

    # Resident weight block (conservatively assume double-buffered).
    w_bytes = 2 * 4 * c4 * coutp * 2
    avail1 = max(budget - w_bytes, 1 << 20)

    # Pass 1 per output row: lo+hi inputs (dbuf bf16) + y out (dbuf bf16)
    # + f32 accumulator + slack for in-kernel slice/reshape copies.
    per_row1 = (4 * (ow + 1) * c4 * 2) + (2 * ow * coutp * 2) \
        + (ow * coutp * 4) + (4 * ow * c4 * 2)
    tr1 = max(1, avail1 // per_row1)
    # Target >= 8 (even) grid steps for v7x megacore + pipeline depth, but keep
    # each step's GEMM M-dim >= ~64 rows when the problem is tiny.
    tr1 = min(tr1, rows, max(_cdiv(rows, 8), _cdiv(64, ow)))
    gm = _cdiv(rows, tr1)
    if gm > 1 and gm % 2 == 1:
        tr1 = _cdiv(rows, gm + 1)
    tr1 = max(1, tr1)

    # Pass 2 (pure streaming): bf16 y in + f32 out, both double-buffered.
    per_row2 = (2 * ow * coutp * 2) + (2 * ow * coutp * 4)
    tr2 = max(1, budget // per_row2)
    tr2 = max(tr1, min(tr2, _cdiv(rows, 4)))
    tr2 = max(tr1, (tr2 // tr1) * tr1)      # multiple of tr1 so both grids divide Rp
    return tr1, tr2, vmem_limit


def conv_forward(x_nchw, weight, bias, gamma, beta):
    """x_nchw: (N, Cin, H, W) f32.  weight: (Cout, Cin, 4, 4) (PyTorch OIHW).
    Returns (N, Cout, OH, OW) f32: Conv2d(4,2,1) -> BatchNorm2d(train) -> LeakyReLU(0.2)."""
    del bias  # Exactly cancelled by training-mode BN mean subtraction (semantics preserved).

    n, cin, h, w = x_nchw.shape
    cout = weight.shape[0]
    assert h % 2 == 0 and w % 2 == 0, "stride-2 4x4 conv path assumes even H, W"
    oh = (h + 2 * PAD - KH) // STRIDE + 1
    ow = (w + 2 * PAD - KW) // STRIDE + 1

    c4 = 4 * cin
    lane_out = 256 if cout >= 256 else LANE          # fill the 2x256 MXU on v6e/v7x
    coutp = _round_up(cout, lane_out)
    rows = n * oh                                    # output rows; M = rows * ow
    m_real = rows * ow

    tr1, tr2, vmem_limit = _pick_tiles(rows, ow, c4, coutp)
    rp = _round_up(rows, tr2)
    gm1 = rp // tr1
    gm2 = rp // tr2

    # ---- XLA prep: pad + 2x2 space-to-depth into two row-shifted bf16 copies.
    x_nhwc = jnp.transpose(x_nchw, (0, 2, 3, 1))
    xp = jnp.pad(x_nhwc, ((0, 0), (PAD, PAD), (PAD, PAD), (0, 0)))
    lo = _space_to_depth_rows(xp, n, oh, ow, cin, 0).astype(jnp.bfloat16)
    hi = _space_to_depth_rows(xp, n, oh, ow, cin, 2).astype(jnp.bfloat16)
    lo = jnp.pad(lo, ((0, rp - rows), (0, 0), (0, 0)))
    hi = jnp.pad(hi, ((0, rp - rows), (0, 0), (0, 0)))

    # (Cout, Cin, KH, KW) -> (4, 4*Cin, Coutp): tap t = 2*dh + dw, channels (ph, pw, ci).
    wt = jnp.transpose(weight, (2, 3, 1, 0))                 # (kh, kw, ci, co)
    w4 = wt.reshape(2, 2, 2, 2, cin, cout)                   # (dh, ph, dw, pw, ci, co)
    w4 = jnp.transpose(w4, (0, 2, 1, 3, 4, 5)).reshape(4, c4, cout)
    w4 = jnp.pad(w4, ((0, 0), (0, 0), (0, coutp - cout))).astype(jnp.bfloat16)

    cparams = pltpu.CompilerParams(
        dimension_semantics=("parallel",),      # independent row tiles -> megacore sharding
        vmem_limit_bytes=int(vmem_limit),
    )

    cost1 = pl.CostEstimate(
        flops=2 * rp * ow * (4 * c4) * coutp,
        transcendentals=0,
        bytes_accessed=2 * rp * (ow + 1) * c4 * 2 + 4 * c4 * coutp * 2
        + rp * ow * coutp * 2 + gm1 * 2 * coutp * 4,
    )

    y, partials = pl.pallas_call(
        _conv_stats_kernel,
        grid=(gm1,),
        in_specs=[
            pl.BlockSpec((tr1, ow + 1, c4), lambda i: (i, 0, 0)),
            pl.BlockSpec((tr1, ow + 1, c4), lambda i: (i, 0, 0)),
            # Constant-index weight block: fetched once, stays VMEM-resident.
            # TODO(synk): pipeline_mode=pl.Buffered(1) would drop its second buffer.
            pl.BlockSpec((4, c4, coutp), lambda i: (0, 0, 0)),
        ],
        out_specs=(
            pl.BlockSpec((tr1, ow, coutp), lambda i: (i, 0, 0)),
            pl.BlockSpec((1, 2, coutp), lambda i: (i, 0, 0)),
        ),
        out_shape=(
            jax.ShapeDtypeStruct((rp, ow, coutp), jnp.bfloat16),
            jax.ShapeDtypeStruct((gm1, 2, coutp), jnp.float32),
        ),
        compiler_params=cparams,
        cost_estimate=cost1,
    )(lo, hi, w4)

    # ---- Global BatchNorm statistics (training mode, biased variance), tiny XLA reduce.
    total = jnp.sum(partials[:, 0, :], axis=0)       # (Coutp,)
    total_sq = jnp.sum(partials[:, 1, :], axis=0)    # (Coutp,)
    mean = total / m_real
    var = jnp.maximum(total_sq / m_real - mean * mean, 0.0)   # guard cancellation
    inv_std = lax.rsqrt(var + BN_EPS)

    gamma_p = jnp.pad(gamma, (0, coutp - cout))
    beta_p = jnp.pad(beta, (0, coutp - cout))
    scale = (gamma_p * inv_std).reshape(1, 1, coutp).astype(jnp.float32)
    shift = (beta_p - mean * gamma_p * inv_std).reshape(1, 1, coutp).astype(jnp.float32)

    cost2 = pl.CostEstimate(
        flops=3 * rp * ow * coutp,
        transcendentals=0,
        bytes_accessed=rp * ow * coutp * (2 + 4) + 2 * coutp * 4,
    )

    out3d = pl.pallas_call(
        _bn_lrelu_kernel,
        grid=(gm2,),
        in_specs=[
            pl.BlockSpec((tr2, ow, coutp), lambda i: (i, 0, 0)),
            pl.BlockSpec((1, 1, coutp), lambda i: (0, 0, 0)),
            pl.BlockSpec((1, 1, coutp), lambda i: (0, 0, 0)),
        ],
        out_specs=pl.BlockSpec((tr2, ow, coutp), lambda i: (i, 0, 0)),
        out_shape=jax.ShapeDtypeStruct((rp, ow, coutp), jnp.float32),
        compiler_params=cparams,
        cost_estimate=cost2,
    )(y, scale, shift)

    out_nhwc = out3d[:rows, :, :cout].reshape(n, oh, ow, cout)
    # TODO(synk): PyTorch API requires NCHW; keep NHWC downstream if possible to
    # avoid this extra read+write (true-NCHW in-kernel stores would be lane-masked).
    return jnp.transpose(out_nhwc, (0, 3, 1, 2))


def _reference(x_nchw, weight, bias, gamma, beta):
    """Pure-JAX reference (conv + train-mode BN + LeakyReLU)."""
    y = lax.conv_general_dilated(
        x_nchw, weight, window_strides=(STRIDE, STRIDE),
        padding=((PAD, PAD), (PAD, PAD)),
        dimension_numbers=("NCHW", "OIHW", "NCHW"),
        precision=lax.Precision.HIGHEST,
    ) + bias.reshape(1, -1, 1, 1)
    mean = jnp.mean(y, axis=(0, 2, 3), keepdims=True)
    var = jnp.mean((y - mean) ** 2, axis=(0, 2, 3), keepdims=True)
    z = (y - mean) / jnp.sqrt(var + BN_EPS) * gamma.reshape(1, -1, 1, 1) + beta.reshape(1, -1, 1, 1)
    return jnp.where(z > 0, z, LRELU_SLOPE * z)


if __name__ == "__main__":
    nin, nout = 4, 8
    n, h, w = 2, 16, 16

    key = jax.random.PRNGKey(0)
    kx, kw_, kb, kg, kbe = jax.random.split(key, 5)

    x = jax.random.normal(kx, (n, nin, h, w), dtype=jnp.float32)
    weight = 0.1 * jax.random.normal(kw_, (nout, nin, KH, KW), dtype=jnp.float32)
    bias = 0.1 * jax.random.normal(kb, (nout,), dtype=jnp.float32)
    gamma = 1.0 + 0.1 * jax.random.normal(kg, (nout,), dtype=jnp.float32)
    beta = 0.1 * jax.random.normal(kbe, (nout,), dtype=jnp.float32)

    out = jax.jit(conv_forward)(x, weight, bias, gamma, beta)
    out = jax.block_until_ready(out)

    ref = _reference(x, weight, bias, gamma, beta)
    assert out.shape == (n, nout, h // 2, w // 2), out.shape
    # Tolerance covers bf16 MXU operands + bf16 storage of the pre-norm y
    # (f32 accumulation and f32 BN statistics/epilogue math).
    assert jnp.allclose(out, ref, atol=3e-2, rtol=2e-2), float(jnp.max(jnp.abs(out - ref)))

    print("KERNEL_OK")
</pallas_src>

<mosaic_0001>
module attributes {stable_mosaic.version = 11 : i64} {
  func.func @_conv_stats_kernel(%arg0: i32, %arg1: memref<8x9x16xbf16, #tpu.memory_space<vmem>>, %arg2: memref<8x9x16xbf16, #tpu.memory_space<vmem>>, %arg3: memref<4x16x128xbf16, #tpu.memory_space<vmem>>, %arg4: memref<8x8x128xbf16, #tpu.memory_space<vmem>>, %arg5: memref<1x2x128xf32, #tpu.memory_space<vmem>>) attributes {dimension_semantics = [#tpu.dimension_semantics<parallel>], iteration_bounds = array<i64: 2>, scalar_prefetch = 0 : i64, scratch_operands = 0 : i64, tpu.core_type = #tpu.core_type<tc>, window_params = [{transform_indices = @transform_0, window_bounds = array<i64: 8, 9, 16>}, {transform_indices = @transform_1, window_bounds = array<i64: 8, 9, 16>}, {pipeline_mode = #tpu.pipeline_mode<synchronous>, transform_indices = @transform_2, window_bounds = array<i64: 4, 16, 128>}, {transform_indices = @transform_3, window_bounds = array<i64: 8, 8, 128>}, {transform_indices = @transform_4, window_bounds = array<i64: 1, 2, 128>}]} {
    %c0 = arith.constant 0 : index
    %c0_0 = arith.constant 0 : index
    %c0_1 = arith.constant 0 : index
    %0 = vector.load %arg1[%c0, %c0_0, %c0_1] : memref<8x9x16xbf16, #tpu.memory_space<vmem>>, vector<8x8x16xbf16>
    %1 = vector.shape_cast %0 : vector<8x8x16xbf16> to vector<64x16xbf16>
    %c0_2 = arith.constant 0 : index
    %c0_3 = arith.constant 0 : index
    %c0_4 = arith.constant 0 : index
    %2 = vector.load %arg3[%c0_2, %c0_3, %c0_4] : memref<4x16x128xbf16, #tpu.memory_space<vmem>>, vector<1x16x128xbf16>
    %3 = vector.shape_cast %2 : vector<1x16x128xbf16> to vector<16x128xbf16>
    %cst = arith.constant dense<0.000000e+00> : vector<64x128xf32>
    %4 = tpu.matmul %1, %3, %cst {dimension_numbers = #tpu.dot_dimension_numbers<[1], [0], [0], [1], [0, 0, 1, 1], [], []>} : vector<64x16xbf16>, vector<16x128xbf16>, vector<64x128xf32> -> vector<64x128xf32>
    %c0_5 = arith.constant 0 : index
    %c1 = arith.constant 1 : index
    %c0_6 = arith.constant 0 : index
    %5 = vector.load %arg1[%c0_5, %c1, %c0_6] : memref<8x9x16xbf16, #tpu.memory_space<vmem>>, vector<8x8x16xbf16>
    %6 = vector.shape_cast %5 : vector<8x8x16xbf16> to vector<64x16xbf16>
    %c1_7 = arith.constant 1 : index
    %c0_8 = arith.constant 0 : index
    %c0_9 = arith.constant 0 : index
    %7 = vector.load %arg3[%c1_7, %c0_8, %c0_9] : memref<4x16x128xbf16, #tpu.memory_space<vmem>>, vector<1x16x128xbf16>
    %8 = vector.shape_cast %7 : vector<1x16x128xbf16> to vector<16x128xbf16>
    %cst_10 = arith.constant dense<0.000000e+00> : vector<64x128xf32>
    %9 = tpu.matmul %6, %8, %cst_10 {dimension_numbers = #tpu.dot_dimension_numbers<[1], [0], [0], [1], [0, 0, 1, 1], [], []>} : vector<64x16xbf16>, vector<16x128xbf16>, vector<64x128xf32> -> vector<64x128xf32>
    %10 = arith.addf %4, %9 : vector<64x128xf32>
    %c0_11 = arith.constant 0 : index
    %c0_12 = arith.constant 0 : index
    %c0_13 = arith.constant 0 : index
    %11 = vector.load %arg2[%c0_11, %c0_12, %c0_13] : memref<8x9x16xbf16, #tpu.memory_space<vmem>>, vector<8x8x16xbf16>
    %12 = vector.shape_cast %11 : vector<8x8x16xbf16> to vector<64x16xbf16>
    %c2 = arith.constant 2 : index
    %c0_14 = arith.constant 0 : index
    %c0_15 = arith.constant 0 : index
    %13 = vector.load %arg3[%c2, %c0_14, %c0_15] : memref<4x16x128xbf16, #tpu.memory_space<vmem>>, vector<1x16x128xbf16>
    %14 = vector.shape_cast %13 : vector<1x16x128xbf16> to vector<16x128xbf16>
    %cst_16 = arith.constant dense<0.000000e+00> : vector<64x128xf32>
    %15 = tpu.matmul %12, %14, %cst_16 {dimension_numbers = #tpu.dot_dimension_numbers<[1], [0], [0], [1], [0, 0, 1, 1], [], []>} : vector<64x16xbf16>, vector<16x128xbf16>, vector<64x128xf32> -> vector<64x128xf32>
    %16 = arith.addf %10, %15 : vector<64x128xf32>
    %c0_17 = arith.constant 0 : index
    %c1_18 = arith.constant 1 : index
    %c0_19 = arith.constant 0 : index
    %17 = vector.load %arg2[%c0_17, %c1_18, %c0_19] : memref<8x9x16xbf16, #tpu.memory_space<vmem>>, vector<8x8x16xbf16>
    %18 = vector.shape_cast %17 : vector<8x8x16xbf16> to vector<64x16xbf16>
    %c3 = arith.constant 3 : index
    %c0_20 = arith.constant 0 : index
    %c0_21 = arith.constant 0 : index
    %19 = vector.load %arg3[%c3, %c0_20, %c0_21] : memref<4x16x128xbf16, #tpu.memory_space<vmem>>, vector<1x16x128xbf16>
    %20 = vector.shape_cast %19 : vector<1x16x128xbf16> to vector<16x128xbf16>
    %cst_22 = arith.constant dense<0.000000e+00> : vector<64x128xf32>
    %21 = tpu.matmul %18, %20, %cst_22 {dimension_numbers = #tpu.dot_dimension_numbers<[1], [0], [0], [1], [0, 0, 1, 1], [], []>} : vector<64x16xbf16>, vector<16x128xbf16>, vector<64x128xf32> -> vector<64x128xf32>
    %22 = arith.addf %16, %21 : vector<64x128xf32>
    %cst_23 = arith.constant dense<0.000000e+00> : vector<128xf32>
    %23 = vector.multi_reduction <add>, %22, %cst_23 [0] : vector<64x128xf32> to vector<128xf32>
    %24 = vector.shape_cast %23 : vector<128xf32> to vector<1x128xf32>
    %25 = arith.mulf %22, %22 : vector<64x128xf32>
    %cst_24 = arith.constant dense<0.000000e+00> : vector<128xf32>
    %26 = vector.multi_reduction <add>, %25, %cst_24 [0] : vector<64x128xf32> to vector<128xf32>
    %27 = vector.shape_cast %26 : vector<128xf32> to vector<1x128xf32>
    %28 = tpu.concatenate %24, %27 in 0 : vector<1x128xf32>, vector<1x128xf32> -> vector<2x128xf32>
    %29 = vector.shape_cast %28 : vector<2x128xf32> to vector<1x2x128xf32>
    %c0_25 = arith.constant 0 : index
    %c0_26 = arith.constant 0 : index
    %c0_27 = arith.constant 0 : index
    %30 = vector.load %arg5[%c0_25, %c0_26, %c0_27] : memref<1x2x128xf32, #tpu.memory_space<vmem>>, vector<1x2x128xf32>
    tpu.vector_store %arg5[%c0_25, %c0_26, %c0_27], %29 {strides = array<i32>} : memref<1x2x128xf32, #tpu.memory_space<vmem>>, vector<1x2x128xf32>,
    %31 = vector.shape_cast %22 : vector<64x128xf32> to vector<8x8x128xf32>
    %32 = arith.truncf %31 : vector<8x8x128xf32> to vector<8x8x128xbf16>
    %c0_28 = arith.constant 0 : index
    %c0_29 = arith.constant 0 : index
    %c0_30 = arith.constant 0 : index
    %33 = vector.load %arg4[%c0_28, %c0_29, %c0_30] : memref<8x8x128xbf16, #tpu.memory_space<vmem>>, vector<8x8x128xbf16>
    tpu.vector_store %arg4[%c0_28, %c0_29, %c0_30], %32 {strides = array<i32>} : memref<8x8x128xbf16, #tpu.memory_space<vmem>>, vector<8x8x128xbf16>,
    return
  }
  func.func @transform_0(%arg0: i32) -> (i32, i32, i32) {
    %c0_i32 = arith.constant 0 : i32
    %c0_i32_0 = arith.constant 0 : i32
    %c0_i32_1 = arith.constant 0 : i32
    return %arg0, %c0_i32, %c0_i32_0 : i32, i32, i32
  }
  func.func @transform_1(%arg0: i32) -> (i32, i32, i32) {
    %c0_i32 = arith.constant 0 : i32
    %c0_i32_0 = arith.constant 0 : i32
    %c0_i32_1 = arith.constant 0 : i32
    return %arg0, %c0_i32, %c0_i32_0 : i32, i32, i32
  }
  func.func @transform_2(%arg0: i32) -> (i32, i32, i32) {
    %c0_i32 = arith.constant 0 : i32
    %c0_i32_0 = arith.constant 0 : i32
    %c0_i32_1 = arith.constant 0 : i32
    %c0_i32_2 = arith.constant 0 : i32
    return %c0_i32, %c0_i32_0, %c0_i32_1 : i32, i32, i32
  }
  func.func @transform_3(%arg0: i32) -> (i32, i32, i32) {
    %c0_i32 = arith.constant 0 : i32
    %c0_i32_0 = arith.constant 0 : i32
    %c0_i32_1 = arith.constant 0 : i32
    return %arg0, %c0_i32, %c0_i32_0 : i32, i32, i32
  }
  func.func @transform_4(%arg0: i32) -> (i32, i32, i32) {
    %c0_i32 = arith.constant 0 : i32
    %c0_i32_0 = arith.constant 0 : i32
    %c0_i32_1 = arith.constant 0 : i32
    return %arg0, %c0_i32, %c0_i32_0 : i32, i32, i32
  }
}

module attributes {stable_mosaic.version = 11 : i64} {
  func.func @_bn_lrelu_kernel(%arg0: i32, %arg1: memref<8x8x128xbf16, #tpu.memory_space<vmem>>, %arg2: memref<1x1x128xf32, #tpu.memory_space<vmem>>, %arg3: memref<1x1x128xf32, #tpu.memory_space<vmem>>, %arg4: memref<8x8x128xf32, #tpu.memory_space<vmem>>) attributes {dimension_semantics = [#tpu.dimension_semantics<parallel>], iteration_bounds = array<i64: 2>, scalar_prefetch = 0 : i64, scratch_operands = 0 : i64, tpu.core_type = #tpu.core_type<tc>, window_params = [{transform_indices = @transform_0, window_bounds = array<i64: 8, 8, 128>}, {pipeline_mode = #tpu.pipeline_mode<synchronous>, transform_indices = @transform_1, window_bounds = array<i64: 1, 1, 128>}, {pipeline_mode = #tpu.pipeline_mode<synchronous>, transform_indices = @transform_2, window_bounds = array<i64: 1, 1, 128>}, {transform_indices = @transform_3, window_bounds = array<i64: 8, 8, 128>}]} {
    %c0 = arith.constant 0 : index
    %c0_0 = arith.constant 0 : index
    %c0_1 = arith.constant 0 : index
    %0 = vector.load %arg1[%c0, %c0_0, %c0_1] : memref<8x8x128xbf16, #tpu.memory_space<vmem>>, vector<8x8x128xbf16>
    %1 = arith.extf %0 : vector<8x8x128xbf16> to vector<8x8x128xf32>
    %c0_2 = arith.constant 0 : index
    %c0_3 = arith.constant 0 : index
    %c0_4 = arith.constant 0 : index
    %2 = vector.load %arg2[%c0_2, %c0_3, %c0_4] : memref<1x1x128xf32, #tpu.memory_space<vmem>>, vector<1x1x128xf32>
    %3 = vector.broadcast %2 : vector<1x1x128xf32> to vector<8x8x128xf32>
    %4 = arith.mulf %1, %3 : vector<8x8x128xf32>
    %c0_5 = arith.constant 0 : index
    %c0_6 = arith.constant 0 : index
    %c0_7 = arith.constant 0 : index
    %5 = vector.load %arg3[%c0_5, %c0_6, %c0_7] : memref<1x1x128xf32, #tpu.memory_space<vmem>>, vector<1x1x128xf32>
    %6 = vector.broadcast %5 : vector<1x1x128xf32> to vector<8x8x128xf32>
    %7 = arith.addf %4, %6 : vector<8x8x128xf32>
    %cst = arith.constant 0.000000e+00 : f32
    %8 = vector.broadcast %cst : f32 to vector<8x8x128xf32>
    %9 = arith.cmpf ogt, %7, %8 : vector<8x8x128xf32>
    %cst_8 = arith.constant 2.000000e-01 : f32
    %10 = vector.broadcast %cst_8 : f32 to vector<8x8x128xf32>
    %11 = arith.mulf %10, %7 : vector<8x8x128xf32>
    %12 = arith.select %9, %7, %11 : vector<8x8x128xi1>, vector<8x8x128xf32>
    %c0_9 = arith.constant 0 : index
    %c0_10 = arith.constant 0 : index
    %c0_11 = arith.constant 0 : index
    %13 = vector.load %arg4[%c0_9, %c0_10, %c0_11] : memref<8x8x128xf32, #tpu.memory_space<vmem>>, vector<8x8x128xf32>
    tpu.vector_store %arg4[%c0_9, %c0_10, %c0_11], %12 {strides = array<i32>} : memref<8x8x128xf32, #tpu.memory_space<vmem>>, vector<8x8x128xf32>,
    return
  }
  func.func @transform_0(%arg0: i32) -> (i32, i32, i32) {
    %c0_i32 = arith.constant 0 : i32
    %c0_i32_0 = arith.constant 0 : i32
    %c0_i32_1 = arith.constant 0 : i32
    return %arg0, %c0_i32, %c0_i32_0 : i32, i32, i32
  }
  func.func @transform_1(%arg0: i32) -> (i32, i32, i32) {
    %c0_i32 = arith.constant 0 : i32
    %c0_i32_0 = arith.constant 0 : i32
    %c0_i32_1 = arith.constant 0 : i32
    %c0_i32_2 = arith.constant 0 : i32
    return %c0_i32, %c0_i32_0, %c0_i32_1 : i32, i32, i32
  }
  func.func @transform_2(%arg0: i32) -> (i32, i32, i32) {
    %c0_i32 = arith.constant 0 : i32
    %c0_i32_0 = arith.constant 0 : i32
    %c0_i32_1 = arith.constant 0 : i32
    %c0_i32_2 = arith.constant 0 : i32
    return %c0_i32, %c0_i32_0, %c0_i32_1 : i32, i32, i32
  }
  func.func @transform_3(%arg0: i32) -> (i32, i32, i32) {
    %c0_i32 = arith.constant 0 : i32
    %c0_i32_0 = arith.constant 0 : i32
    %c0_i32_1 = arith.constant 0 : i32
    return %arg0, %c0_i32, %c0_i32_0 : i32, i32, i32
  }
}

</mosaic_0001>

<bundles_post_ra>
// kernel: conv_forward.3
= control target key start
LH: loop header
LB: loop body
LE: loop exit
PB: predicated region body
PF: predicated region fallthrough
CT: control target
= control target key end

     0   :  { %s376_s12 = smov 0   ;;  %s413_s0 = inlined_call_operand.vmem [shape: bf16[16,8,128], index: 0, kind: input, shape index: {}]   ;;  %s414_s1 = inlined_call_operand.vmem [shape: f32[1,1,128], index: 1, kind: input, shape index: {}]   ;;  %s415_s2 = inlined_call_operand.vmem [shape: f32[1,1,128], index: 2, kind: input, shape index: {}]   ;;  %s416_s3 = inlined_call_operand.vmem [shape: f32[16,8,128], index: 3, kind: output, shape index: {}]  }
   0x1 LB: > { %s308_s13 = sadd.s32 4294967295, %s354_s12   ;;  %p312_p0 = scmp.ge.s32.totalorder %s354_s12, 1  ;;  %s354_s12 = sphi %s376_s12, %s13_s12  }
   0x2   : > { %p138_p1 = scmp.lt.s32.totalorder %s354_s12, 3 }
   0x4   : > { %p139_p2 = pnand %p312_p0, %p138_p1 }
   0x5   : > { %s313_s14 = sshll.u32 (!%p139_p2), %s308_s13, 3  ;;  %v317_v0 = vld [vmem:[%s414_s1] ss:$0 sm:$0xff] (!%p139_p2) }
   0x6   : > { %142 = sbr.rel (%p139_p2) target bundleno = 32 (0x20), region = 32  ;;  %p163_p3 = scmp.lt.s32.totalorder (!%p139_p2), %s313_s14, 15  ;;  %v318_v9 = vld [vmem:[%s415_s2] ss:$0 sm:$0xff] (!%p139_p2) }
   0xd   : > { %s418_s14 = smov (!%p163_p3, %s313_s14), 15 }
   0xe   : > { %s314_s15 = sshll.u32 %s418_s14, 2  ;;  %s316_s23 = sshll.u32 %s418_s14, 3 }
   0xf   : > { %s166_s18 = scalar_lea.vmem %s413_s0, %s314_s15  ;;  %s400_s26 = scalar_lea.vmem %s416_s3, %s316_s23 }
  0x10   : > { %v322_v1 = vld [vmem:[%s166_s18] sm:$0xff]   ;;  %v337_v2 = vld [vmem:[%s166_s18 + $0x8] sm:$0xff]   ;;  %v338_v3 = vld [vmem:[%s166_s18 + $0x10] sm:$0xff]  }
  0x11   : > { %v323_v4 = vunpack.c.l.bf16 %v322_v1  ;;  %v324_v5 = vunpack.c.h.bf16 %v322_v1  ;;  %v327_v6 = vunpack.c.l.bf16 %v337_v2  ;;  %v328_v7 = vunpack.c.h.bf16 %v337_v2  ;;  %v339_v8 = vld [vmem:[%s166_s18 + $0x18] sm:$0xff]  }
  0x12   : > { %v331_v10 = vunpack.c.l.bf16 %v338_v3  ;;  %v332_v11 = vunpack.c.h.bf16 %v338_v3  ;;  %v335_v12 = vunpack.c.l.bf16 %v339_v8  ;;  %v336_v13 = vunpack.c.h.bf16 %v339_v8 }
  0x13   : > { %v197_v14 = vmul.f32 %v323_v4, %v317_v0  ;;  %v198_v15 = vmul.f32 %v324_v5, %v317_v0  ;;  %v199_v16 = vmul.f32 %v327_v6, %v317_v0  ;;  %v200_v17 = vmul.f32 %v328_v7, %v317_v0 }
  0x14   : > { %v201_v18 = vmul.f32 %v331_v10, %v317_v0  ;;  %v202_v19 = vmul.f32 %v332_v11, %v317_v0  ;;  %v203_v20 = vmul.f32 %v335_v12, %v317_v0  ;;  %v204_v21 = vmul.f32 %v336_v13, %v317_v0 }
  0x15   : > { %v212_v22 = vadd.f32 %v318_v9, %v197_v14  ;;  %v213_v23 = vadd.f32 %v318_v9, %v198_v15  ;;  %v214_v24 = vadd.f32 %v318_v9, %v199_v16  ;;  %v215_v25 = vadd.f32 %v318_v9, %v200_v17 }
  0x16   : > { %v216_v26 = vadd.f32 %v318_v9, %v201_v18  ;;  %v217_v27 = vadd.f32 %v318_v9, %v202_v19  ;;  %v218_v28 = vadd.f32 %v318_v9, %v203_v20  ;;  %v219_v29 = vadd.f32 %v318_v9, %v204_v21 }
  0x17   : > { %vm220_vm0 = vcmp.gt.f32.partialorder %v212_v22, 0.0  ;;  %v228_v30 = vmul.f32 0.2, %v212_v22  ;;  %vm221_vm1 = vcmp.gt.f32.partialorder %v213_v23, 0.0  ;;  %v229_v31 = vmul.f32 0.2, %v213_v23 }
  0x18   : > { %vm222_vm2 = vcmp.gt.f32.partialorder %v214_v24, 0.0  ;;  %v230_v32 = vmul.f32 0.2, %v214_v24  ;;  %vm223_vm3 = vcmp.gt.f32.partialorder %v215_v25, 0.0  ;;  %v231_v33 = vmul.f32 0.2, %v215_v25 }
  0x19   : > { %v236_v34 = vsel %vm220_vm0, %v212_v22, %v228_v30  ;;  %v237_v35 = vsel %vm221_vm1, %v213_v23, %v229_v31  ;;  %vm224_vm4 = vcmp.gt.f32.partialorder %v216_v26, 0.0  ;;  %v232_v36 = vmul.f32 0.2, %v216_v26 }
  0x1a   : > { %244 = vst [vmem:[%s400_s26] sm:$0xff] %v236_v34  ;;  %245 = vst [vmem:[%s400_s26 + $0x8] sm:$0xff] %v237_v35  ;;  %v238_v37 = vsel %vm222_vm2, %v214_v24, %v230_v32  ;;  %v239_v38 = vsel %vm223_vm3, %v215_v25, %v231_v33  ;;  %vm225_vm5 = vcmp.gt.f32.partialorder %v217_v27, 0.0  ;;  %v233_v39 = vmul.f32 0.2, %v217_v27 }
  0x1b   : > { %246 = vst [vmem:[%s400_s26 + $0x10] sm:$0xff] %v238_v37  ;;  %247 = vst [vmem:[%s400_s26 + $0x18] sm:$0xff] %v239_v38  ;;  %v240_v40 = vsel %vm224_vm4, %v216_v26, %v232_v36  ;;  %vm226_vm6 = vcmp.gt.f32.partialorder %v218_v28, 0.0  ;;  %v234_v41 = vmul.f32 0.2, %v218_v28  ;;  %vm227_vm7 = vcmp.gt.f32.partialorder %v219_v29, 0.0 }
  0x1c   : > { %248 = vst [vmem:[%s400_s26 + $0x20] sm:$0xff] %v240_v40  ;;  %v241_v42 = vsel %vm225_vm5, %v217_v27, %v233_v39  ;;  %v235_v43 = vmul.f32 0.2, %v219_v29 }
  0x1d   : > { %249 = vst [vmem:[%s400_s26 + $0x28] sm:$0xff] %v241_v42  ;;  %v242_v44 = vsel %vm226_vm6, %v218_v28, %v234_v41 }
  0x1e   : > { %250 = vst [vmem:[%s400_s26 + $0x30] sm:$0xff] %v242_v44  ;;  %v243_v45 = vsel %vm227_vm7, %v219_v29, %v235_v43 }
  0x1f   : > { %251 = vst [vmem:[%s400_s26 + $0x38] sm:$0xff] %v243_v45 }
  0x20 PF: > { %s13_s12 = sadd.s32 1, %s354_s12  }
  0x21   : > { %p10_p4 = scmp.ge.s32.totalorder %s13_s12, 4  }
  0x23   :  { %12 = sbr.rel (!%p10_p4) target bundleno = 1 (0x1), region = 62 }

// kernel: conv_forward.2
= control target key start
LH: loop header
LB: loop body
LE: loop exit
PB: predicated region body
PF: predicated region fallthrough
CT: control target
= control target key end

     0   :  { %s1304_s15 = smov 0   ;;  %s1492_s0 = inlined_call_operand.vmem [shape: bf16[16,9,16], index: 0, kind: input, shape index: {}]   ;;  %s1493_s1 = inlined_call_operand.vmem [shape: bf16[16,9,16], index: 1, kind: input, shape index: {}]   ;;  %s1494_s2 = inlined_call_operand.vmem [shape: bf16[4,16,128], index: 2, kind: input, shape index: {}]   ;;  %s1495_s3 = inlined_call_operand.vmem [shape: bf16[16,8,128], index: 3, kind: output, shape index: {0}]   ;;  %s1496_s4 = inlined_call_operand.vmem [shape: f32[2,2,128], index: 4, kind: output, shape index: {1}]  }
   0x1 LB: > { %s1310_s16 = sadd.s32 4294967295, %s1277_s15   ;;  %p1088_p0 = scmp.ge.s32.totalorder %s1277_s15, 1  ;;  %s1277_s15 = sphi %s1304_s15, %s15_s15  }
   0x2   : > { %p179_p1 = scmp.lt.s32.totalorder %s1277_s15, 3 }
   0x4   : > { %p180_p2 = pnand %p1088_p0, %p179_p1 }
   0x5   : > { %v1259_v0 = vld [vmem:[%s1494_s2 + $0x10] sm:$0xff] (!%p180_p2)   ;;  %s1089_s19 = sshll.u32 (!%p180_p2), %s1310_s16, 3  ;;  %v1262_v1 = vld [vmem:[%s1494_s2 + $0x8] sm:$0xff] (!%p180_p2)   ;;  %v1324_v2 = vld [vmem:[%s1494_s2] sm:$0xff] (!%p180_p2)   ;;  %vm395_vm0 = vcmask (!%p180_p2), 130048   ;;  %p236_p4 = scmp.lt.s32.totalorder (!%p180_p2), %s1310_s16, 1 }
   0x6   : > { %183 = sbr.rel (%p180_p2) target bundleno = 310 (0x136), region = 32  ;;  %p217_p3 = scmp.lt.s32.totalorder (!%p180_p2), %s1089_s19, 15  ;;  %1207 = vmatprep.subr.bf16.mxu0 (!%p180_p2), %v1259_v0  ;;  %1187 = vmatprep.subr.bf16.mxu1 (!%p180_p2), %v1262_v1  ;;  %v1266_v3 = vld [vmem:[%s1494_s2 + $0x18] sm:$0xff] (!%p180_p2)   ;;  %vm259_vm1 = vsmask.f32 (!%p180_p2), 3328  ;;  %vm966_vm4 = vcmask (!%p180_p2), 1040384  }
   0x7   : > { %1208 = vmatpush3.bf16.msra.mxu0 (!%p180_p2), %v1259_v0  ;;  %1188 = vmatpush3.bf16.msra.mxu1 (!%p180_p2), %v1262_v1  ;;  %vm260_vm2 = vsmask.f32 (!%p180_p2), 7440 }
   0x8   : > { %1197 = vmatprep.subr.bf16.mxu1 (!%p180_p2), %v1324_v2  ;;  %1217 = vmatprep.subr.bf16.mxu0 (!%p180_p2), %v1266_v3  ;;  %vm1374_vm3 = vmor (!%p180_p2), %vm259_vm1, %vm260_vm2 }
   0xd   : > { %s1500_s19 = smov (!%p217_p3, %s1089_s19), 15  ;;  %s1502_s16 = smov (!%p236_p4, %s1310_s16), 1 }
   0xe   : > { %s1142_s26 = sshll.u32 %s1500_s19, 3  ;;  %s1096_s7 = sshll.u32 %s1500_s19, 2 }
   0xf   : > { %s1335_s29 = scalar_lea.vmem %s1493_s1, %s1142_s26  ;;  %s1342_s6 = scalar_lea.vmem %s1492_s0, %s1142_s26 }
  0x10   : > { %v1260_v4 = vld [vmem:[%s1335_s29] ss:$8 sps:$4 sm:$0xff]   ;;  %v1261_v5 = vld [vmem:[%s1335_s29 + $0x10] ss:$8 sps:$4 sm:$0xff]   ;;  %v251_v9 = vld [vmem:[%s1342_s6 + $0x4] sm:$0x1]  ;;  %s1478_s10 = scalar_lea.vmem %s1495_s3, %s1096_s7 }
  0x11   : > { %1209 = vmatprep.mubr.msk.bf16.mxu0 %vm395_vm0, %v1260_v4  ;;  %v1263_v6 = vld [vmem:[%s1335_s29 + $0x20] ss:$8 sps:$4 sm:$0xff]   ;;  %v252_v10 = vld [vmem:[%s1342_s6 + $0xc] sm:$0x1]  ;;  %v272_v13 = vshll.u32 %v251_v9, 16  ;;  %s1097_s11 = sshll.u32 %s1502_s16, 1 }
  0x12   : > { %1210 = vmatmul.mubr.msk.bf16.vlgmr.msra.gmra.mrb[0].mxu0 %vm395_vm0, %v1261_v5  ;;  %v1349_v7 = vld [vmem:[%s1342_s6] sm:$0xf]  ;;  %v1352_v8 = vld [vmem:[%s1342_s6 + $0x8] sm:$0xf]  ;;  %v286_v16 = vshll.u32 %v252_v10, 16  ;;  %s239_s14 = scalar_lea.vmem %s1496_s4, %s1097_s11 }
  0x13   : > { %1213 = vmatprep.mubr.msk.bf16.mxu0 %vm395_vm0, %v1263_v6  ;;  %v263_v11 = vshrl.u32 %v1349_v7, 16  ;;  %v266_v12 = vshll.u32 %v1349_v7, 16  ;;  %v277_v14 = vshrl.u32 %v1352_v8, 16  ;;  %1218 = vmatpush3.bf16.msra.mxu0 %v1266_v3  ;;  %v280_v15 = vshll.u32 %v1352_v8, 16  ;;  %v1265_v21 = vld [vmem:[%s1335_s29 + $0x30] ss:$8 sps:$4 sm:$0xff]  }
  0x14   : > { %v274_v19 = vrot.slane %v272_v13, 5  ;;  %v288_v23 = vrot.slane %v286_v16, 5  ;;  %v1363_v24 = vld [vmem:[%s1342_s6 + $0x10] sm:$0xf]  ;;  %v1366_v25 = vld [vmem:[%s1342_s6 + $0x18] sm:$0xf] }
  0x15   : > { %v265_v17 = vrot.slane %v263_v11, 4  ;;  %v268_v18 = vrot.slane %v266_v12, 5  ;;  %v279_v20 = vrot.slane %v277_v14, 4  ;;  %v282_v22 = vrot.slane %v280_v15, 5  ;;  %v253_v27 = vld [vmem:[%s1342_s6 + $0x14] sm:$0x1] }
  0x16   : > { %v254_v28 = vld [vmem:[%s1342_s6 + $0x1c] sm:$0x1]  ;;  %v291_v29 = vshrl.u32 %v1363_v24, 16  ;;  %v294_v30 = vshll.u32 %v1363_v24, 16  ;;  %v300_v33 = vshll.u32 %v253_v27, 16  ;;  %v305_v34 = vshrl.u32 %v1366_v25, 16 }
  0x17   : > { %v269_v26 = vor.u32 %v268_v18, %v265_v17  ;;  %v283_v32 = vor.u32 %v282_v22, %v279_v20  ;;  %v308_v35 = vshll.u32 %v1366_v25, 16  ;;  %v698_v36 = vld [vmem:[%s1335_s29] sm:$0xf]  ;;  %v314_v40 = vshll.u32 %v254_v28, 16  ;;  %v699_v41 = vld [vmem:[%s1335_s29 + $0x4] sm:$0x1] }
  0x18   : > { %v293_v38 = vrot.slane %v291_v29, 4  ;;  %v296_v39 = vrot.slane %v294_v30, 5  ;;  %v302_v43 = vrot.slane %v300_v33, 5  ;;  %v307_v44 = vrot.slane %v305_v34, 4  ;;  %v700_v46 = vld [vmem:[%s1335_s29 + $0x8] sm:$0xf] }
  0x19   : > { %v270_v37 = vrot.slane %v269_v26, 4  ;;  %v284_v42 = vrot.slane %v283_v32, 4  ;;  %v310_v45 = vrot.slane %v308_v35, 5  ;;  %v316_v49 = vrot.slane %v314_v40, 5  ;;  %v701_v53 = vld [vmem:[%s1335_s29 + $0xc] sm:$0x1] }
  0x1a   : > { %1214 = vmatmul.mubr.msk.bf16.gmra.mrb[4].mxu0 %vm395_vm0, %v1265_v21  ;;  %v297_v48 = vor.u32 %v296_v39, %v293_v38  ;;  %v715_v50 = vshrl.u32 %v698_v36, 16  ;;  %v718_v54 = vshll.u32 %v698_v36, 16  ;;  %v724_v55 = vshll.u32 %v699_v41, 16  ;;  %v1390_v56 = vld [vmem:[%s1342_s6 + $0x20] sm:$0xf] }
  0x1b   : > { %v275_v47 = vsel %vm1374_vm3, %v270_v37, %v274_v19  ;;  %v289_v51 = vsel %vm1374_vm3, %v284_v42, %v288_v23  ;;  %v311_v52 = vor.u32 %v310_v45, %v307_v44  ;;  %v729_v60 = vshrl.u32 %v700_v46, 16  ;;  %v255_v1 = vld [vmem:[%s1342_s6 + $0x24] sm:$0x1]  ;;  %v1397_v6 = vld [vmem:[%s1342_s6 + $0x28] sm:$0xf] }
  0x1c   : > { %v1100_v57 = vcombine.low %v275_v47, %v289_v51  ;;  %v298_v58 = vrot.slane %v297_v48, 4  ;;  %v717_v59 = vrot.slane %v715_v50, 4  ;;  %v720_v62 = vrot.slane %v718_v54, 5  ;;  %v256_v13 = vld [vmem:[%s1342_s6 + $0x2c] sm:$0x1] }
  0x1d   : > { %v312_v61 = vrot.slane %v311_v52, 4  ;;  %v726_v63 = vrot.slane %v724_v55, 5  ;;  %v732_v0 = vshll.u32 %v700_v46, 16  ;;  %v731_v4 = vrot.slane %v729_v60, 4  ;;  %v702_v15 = vld [vmem:[%s1335_s29 + $0x10] sm:$0xf] }
  0x1e   : > { %1189 = vmatprep.mubr.msk.bf16.mxu1 %vm395_vm0, %v1100_v57  ;;  %v303_v3 = vsel %vm1374_vm3, %v298_v58, %v302_v43  ;;  %v738_v5 = vshll.u32 %v701_v53, 16  ;;  %v319_v9 = vshrl.u32 %v1390_v56, 16  ;;  %v721_v11 = vor.u32 %v720_v62, %v717_v59  ;;  %v703_v26 = vld [vmem:[%s1335_s29 + $0x14] sm:$0x1]  ;;  %v704_v30 = vld [vmem:[%s1335_s29 + $0x18] sm:$0xf] }
  0x1f   : > { %v317_v10 = vsel %vm1374_vm3, %v312_v61, %v316_v49  ;;  %v734_v12 = vrot.slane %v732_v0, 5  ;;  %v322_v14 = vshll.u32 %v1390_v56, 16  ;;  %v328_v19 = vshll.u32 %v255_v1, 16  ;;  %v705_v39 = vld [vmem:[%s1335_s29 + $0x1c] sm:$0x1] }
  0x20   : > { %v1101_v16 = vcombine.low %v303_v3, %v317_v10  ;;  %v740_v17 = vrot.slane %v738_v5, 5  ;;  %v321_v18 = vrot.slane %v319_v9, 4  ;;  %v722_v20 = vrot.slane %v721_v11, 4  ;;  %v1420_v50 = vld [vmem:[%s1342_s6 + $0x38] sm:$0xf] }
  0x21   : > { %v735_v21 = vor.u32 %v734_v12, %v731_v4  ;;  %v324_v22 = vrot.slane %v322_v14, 5  ;;  %v333_v23 = vshrl.u32 %v1397_v6, 16  ;;  %v330_v27 = vrot.slane %v328_v19, 5  ;;  %v257_v51 = vld [vmem:[%s1342_s6 + $0x34] sm:$0x1] }
  0x22   : > { %1190 = vmatmul.mubr.msk.bf16.vlgmr.msra.gmra.mrb[0].mxu1 %vm395_vm0, %v1101_v16  ;;  %v336_v28 = vshll.u32 %v1397_v6, 16  ;;  %v342_v29 = vshll.u32 %v256_v13, 16  ;;  %v743_v32 = vshrl.u32 %v702_v15, 16  ;;  %v727_v33 = vsel %vm1374_vm3, %v722_v20, %v726_v63  ;;  %v258_v62 = vld [vmem:[%s1342_s6 + $0x3c] sm:$0x1] }
  0x23   : > { %1198 = vmatpush3.bf16.msra.mxu1 %v1324_v2  ;;  %v736_v34 = vrot.slane %v735_v21, 4  ;;  %v325_v35 = vor.u32 %v324_v22, %v321_v18  ;;  %v335_v36 = vrot.slane %v333_v23, 4  ;;  %v746_v41 = vshll.u32 %v702_v15, 16  ;;  %v1417_v2 = vld [vmem:[%s1342_s6 + $0x30] sm:$0xf] }
  0x24   : > { %v338_v37 = vrot.slane %v336_v28, 5  ;;  %v344_v38 = vrot.slane %v342_v29, 5  ;;  %v745_v40 = vrot.slane %v743_v32, 4  ;;  %v752_v44 = vshll.u32 %v703_v26, 16  ;;  %v706_v10 = vld [vmem:[%s1335_s29 + $0x20] sm:$0xf] }
  0x25   : > { %v741_v42 = vsel %vm1374_vm3, %v736_v34, %v740_v17  ;;  %v326_v43 = vrot.slane %v325_v35, 4  ;;  %v757_v45 = vshrl.u32 %v704_v30, 16  ;;  %v748_v48 = vrot.slane %v746_v41, 5  ;;  %v707_v11 = vld [vmem:[%s1335_s29 + $0x24] sm:$0x1] }
  0x26   : > { %v1131_v46 = vcombine.low %v727_v33, %v741_v42  ;;  %v339_v47 = vor.u32 %v338_v37, %v335_v36  ;;  %v760_v49 = vshll.u32 %v704_v30, 16  ;;  %v754_v53 = vrot.slane %v752_v44, 5  ;;  %v708_v15 = vld [vmem:[%s1335_s29 + $0x28] sm:$0xf]  ;;  %v709_v22 = vld [vmem:[%s1335_s29 + $0x2c] sm:$0x1] }
  0x27   : > { %v331_v52 = vsel %vm1374_vm3, %v326_v43, %v330_v27  ;;  %v759_v54 = vrot.slane %v757_v45, 4  ;;  %v766_v55 = vshll.u32 %v705_v39, 16  ;;  %v749_v58 = vor.u32 %v748_v48, %v745_v40  ;;  %v710_v30 = vld [vmem:[%s1335_s29 + $0x30] sm:$0xf]  ;;  %v711_v36 = vld [vmem:[%s1335_s29 + $0x34] sm:$0x1] }
  0x28   : > { %1219 = vmatprep.mubr.msk.bf16.mxu0 %vm395_vm0, %v1131_v46  ;;  %v340_v57 = vrot.slane %v339_v47, 4  ;;  %v762_v59 = vrot.slane %v760_v49, 5  ;;  %v347_v60 = vshrl.u32 %v1417_v2, 16  ;;  %v350_v63 = vshll.u32 %v1417_v2, 16  ;;  %v712_v41 = vld [vmem:[%s1335_s29 + $0x38] sm:$0xf] }
  0x29   : > { %v768_v61 = vrot.slane %v766_v55, 5  ;;  %v356_v0 = vshll.u32 %v257_v51, 16  ;;  %v361_v1 = vshrl.u32 %v1420_v50, 16  ;;  %v750_v4 = vrot.slane %v749_v58, 4 }
  0x2a   : > { %v345_v3 = vsel %vm1374_vm3, %v340_v57, %v344_v38  ;;  %v763_v5 = vor.u32 %v762_v59, %v759_v54  ;;  %v349_v9 = vrot.slane %v347_v60, 4  ;;  %v352_v13 = vrot.slane %v350_v63, 5 }
  0x2b   : > { %v1102_v12 = vcombine.low %v331_v52, %v345_v3  ;;  %v363_v14 = vrot.slane %v361_v1, 4  ;;  %v1109_v16 = vcombine.low %v1349_v7, %v1352_v8  ;;  %v755_v17 = vsel %vm1374_vm3, %v750_v4, %v754_v53  ;;  %v713_v52 = vld [vmem:[%s1335_s29 + $0x3c] sm:$0x1] }
  0x2c   : > { %v764_v18 = vrot.slane %v763_v5, 4  ;;  %v364_v19 = vshll.u32 %v1420_v50, 16  ;;  %v370_v20 = vshll.u32 %v258_v62, 16  ;;  %v353_v21 = vor.u32 %v352_v13, %v349_v9 }
  0x2d   : > { %1193 = vmatprep.mubr.msk.bf16.mxu1 %vm395_vm0, %v1102_v12  ;;  %v771_v23 = vshrl.u32 %v706_v10, 16  ;;  %v774_v26 = vshll.u32 %v706_v10, 16  ;;  %v780_v27 = vshll.u32 %v707_v11, 16  ;;  %v358_v7 = vrot.slane %v356_v0, 5 }
  0x2e   : > { %v769_v28 = vsel %vm1374_vm3, %v764_v18, %v768_v61  ;;  %v366_v8 = vrot.slane %v364_v19, 5  ;;  %v785_v29 = vshrl.u32 %v708_v15, 16  ;;  %v354_v33 = vrot.slane %v353_v21, 4 }
  0x2f   : > { %v1132_v32 = vcombine.low %v755_v17, %v769_v28  ;;  %v773_v34 = vrot.slane %v771_v23, 4  ;;  %v776_v35 = vrot.slane %v774_v26, 5  ;;  %v372_v38 = vrot.slane %v370_v20, 5 }
  0x30   : > { %v367_v37 = vor.u32 %v366_v8, %v363_v14  ;;  %v787_v39 = vrot.slane %v785_v29, 4  ;;  %v788_v40 = vshll.u32 %v708_v15, 16  ;;  %v782_v43 = vrot.slane %v780_v27, 5 }
  0x31   : > { %1220 = vmatmul.mubr.msk.bf16.vlgmr.msra.gmra.mrb[0].mxu0 %vm395_vm0, %v1132_v32  ;;  %v777_v42 = vor.u32 %v776_v35, %v773_v34  ;;  %v794_v44 = vshll.u32 %v709_v22, 16  ;;  %v799_v45 = vshrl.u32 %v710_v30, 16  ;;  %v359_v46 = vsel %vm1374_vm3, %v354_v33, %v358_v7 }
  0x32   : > { %v368_v47 = vrot.slane %v367_v37, 4  ;;  %v790_v48 = vrot.slane %v788_v40, 5  ;;  %v802_v49 = vshll.u32 %v710_v30, 16  ;;  %v808_v54 = vshll.u32 %v711_v36, 16 }
  0x33   : > { %v778_v51 = vrot.slane %v777_v42, 4  ;;  %v801_v53 = vrot.slane %v799_v45, 4  ;;  %v813_v55 = vshrl.u32 %v712_v41, 16  ;;  %v796_v59 = vrot.slane %v794_v44, 5 }
  0x34   : > { %v373_v57 = vsel %vm1374_vm3, %v368_v47, %v372_v38  ;;  %v791_v58 = vor.u32 %v790_v48, %v787_v39  ;;  %v804_v60 = vrot.slane %v802_v49, 5  ;;  %v816_v63 = vshll.u32 %v712_v41, 16 }
  0x35   : > { %v1103_v61 = vcombine.low %v359_v46, %v373_v57  ;;  %v815_v62 = vrot.slane %v813_v55, 4  ;;  %v783_v0 = vsel %vm1374_vm3, %v778_v51, %v782_v43  ;;  %v822_v4 = vshll.u32 %v713_v52, 16 }
  0x36   : > { %v792_v1 = vrot.slane %v791_v58, 4  ;;  %v805_v3 = vor.u32 %v804_v60, %v801_v53  ;;  %v810_v5 = vrot.slane %v808_v54, 5  ;;  %v818_v9 = vrot.slane %v816_v63, 5 }
  0x37   : > { %1194 = vmatmul.mubr.msk.bf16.gmra.mrb[4].mxu1 %vm395_vm0, %v1103_v61  ;;  %v824_v14 = vrot.slane %v822_v4, 5  ;;  %v1110_v18 = vcombine.low %v1363_v24, %v1366_v25  ;;  %v1111_v19 = vcombine.low %v1390_v56, %v1397_v6  ;;  %v1112_v21 = vcombine.low %v1417_v2, %v1420_v50 }
  0x38   : > { %v797_v10 = vsel %vm1374_vm3, %v792_v1, %v796_v59  ;;  %1199 = vmatprep.mubr.msk.bf16.mxu1 %vm395_vm0, %v1109_v16  ;;  %v806_v11 = vrot.slane %v805_v3, 4  ;;  %v819_v13 = vor.u32 %v818_v9, %v815_v62 }
  0x39   : > { %v1133_v12 = vcombine.low %v783_v0, %v797_v10 }
  0x3a   : > { %v811_v15 = vsel %vm1374_vm3, %v806_v11, %v810_v5  ;;  %v820_v17 = vrot.slane %v819_v13, 4 }
  0x3b   : > { %1223 = vmatprep.mubr.msk.bf16.mxu0 %vm395_vm0, %v1133_v12 }
  0x3c   : > { %v825_v16 = vsel %vm1374_vm3, %v820_v17, %v824_v14 }
  0x3d   : > { %v1134_v20 = vcombine.low %v811_v15, %v825_v16 }
  0x3f   : > { %1200 = vmatmul.mubr.msk.bf16.vlgmr.msra.gmra.mrb[0].mxu1 %vm395_vm0, %v1110_v18  ;;  %1224 = vmatmul.mubr.msk.bf16.gmra.mrb[4].mxu0 %vm395_vm0, %v1134_v20 }
  0x40   : > { %1203 = vmatprep.mubr.msk.bf16.mxu1 %vm395_vm0, %v1111_v19 }
  0x47   : > { %1204 = vmatmul.mubr.msk.bf16.gmra.mrb[4].mxu1 %vm395_vm0, %v1112_v21 }
 0x104   : > { %v1221_v24 = vpop.f32.mrb[0].mxu0 }
 0x105   : > { %v893_v25 = vpop.f32.mrb[1].mxu0 }
 0x106   : > { %v1222_v22 = vpop.f32.mrb[2].mxu0 }
 0x107   : > { %v896_v56 = vpop.f32.mrb[3].mxu0 }
 0x112   : > { %v1201_v6 = vpop.f32.mrb[0].mxu1  ;;  %v1225_v31 = vpop.f32.mrb[4].mxu0 }
 0x113   : > { %v1227_v23 = vadd.f32 %v1221_v24, %v1201_v6  ;;  %v545_v26 = vpop.f32.mrb[1].mxu1  ;;  %v909_v27 = vpop.f32.mrb[5].mxu0 }
 0x114   : > { %v1228_v28 = vadd.f32 %v893_v25, %v545_v26  ;;  %v1202_v7 = vpop.f32.mrb[2].mxu1  ;;  %v1226_v8 = vpop.f32.mrb[6].mxu0 }
 0x115   : > { %v1229_v29 = vadd.f32 %v1222_v22, %v1202_v7  ;;  %v548_v30 = vpop.f32.mrb[3].mxu1  ;;  %v912_v2 = vpop.f32.mrb[7].mxu0  ;;  %v947_v37 = vmul.f32 %v1227_v23, %v1227_v23 }
 0x116   : > { %v1230_v50 = vadd.f32 %v896_v56, %v548_v30  ;;  %v945_v33 = vmul.f32 %v1228_v28, %v1228_v28 }
 0x117   : > { %v1152_v32 = vpack.c.bf16 %v1229_v29, %v1227_v23  ;;  %v948_v43 = vmul.f32 %v1229_v29, %v1229_v29 }
 0x118   : > { %v932_v34 = vadd.f32 %v1230_v50, %v1228_v28  ;;  %v946_v35 = vmul.f32 %v1230_v50, %v1230_v50  ;;  %v1147_v36 = vpack.c.bf16 %v1230_v50, %v1228_v28 }
 0x119   : > { %1164 = vst [vmem:[%s1478_s10 + $0x8] sm:$0xff] %v1152_v32  }
 0x11a   : > { %v933_v38 = vadd.f32 %v1227_v23, %v932_v34  ;;  %v953_v39 = vadd.f32 %v946_v35, %v945_v33  ;;  %1148 = vst [vmem:[%s1478_s10] sm:$0xff] %v1147_v36   ;;  %v1205_v40 = vpop.f32.mrb[4].mxu1 }
 0x11b   : > { %v1231_v41 = vadd.f32 %v1225_v31, %v1205_v40  ;;  %v561_v42 = vpop.f32.mrb[5].mxu1 }
 0x11c   : > { %v954_v44 = vadd.f32 %v953_v39, %v947_v37  ;;  %v1232_v45 = vadd.f32 %v909_v27, %v561_v42  ;;  %v934_v46 = vadd.f32 %v1229_v29, %v933_v38  ;;  %v1206_v47 = vpop.f32.mrb[6].mxu1 }
 0x11d   : > { %v1233_v48 = vadd.f32 %v1226_v8, %v1206_v47  ;;  %v564_v49 = vpop.f32.mrb[7].mxu1  ;;  %v951_v61 = vmul.f32 %v1231_v41, %v1231_v41 }
 0x11e   : > { %v935_v51 = vadd.f32 %v1232_v45, %v934_v46  ;;  %v949_v52 = vmul.f32 %v1232_v45, %v1232_v45  ;;  %v955_v53 = vadd.f32 %v954_v44, %v948_v43  ;;  %v1234_v54 = vadd.f32 %v912_v2, %v564_v49 }
 0x11f   : > { %v1162_v55 = vpack.c.bf16 %v1233_v48, %v1231_v41  ;;  %v952_v0 = vmul.f32 %v1233_v48, %v1233_v48 }
 0x120   : > { %v956_v57 = vadd.f32 %v955_v53, %v949_v52  ;;  %v936_v58 = vadd.f32 %v1234_v54, %v935_v51  ;;  %v950_v59 = vmul.f32 %v1234_v54, %v1234_v54  ;;  %v1157_v60 = vpack.c.bf16 %v1234_v54, %v1232_v45 }
 0x121   : > { %1166 = vst [vmem:[%s1478_s10 + $0x18] sm:$0xff] %v1162_v55  }
 0x122   : > { %v937_v62 = vadd.f32 %v1231_v41, %v936_v58  ;;  %v957_v63 = vadd.f32 %v956_v57, %v950_v59  ;;  %1165 = vst [vmem:[%s1478_s10 + $0x10] sm:$0xff] %v1157_v60  }
 0x124   : > { %v938_v1 = vadd.f32 %v1233_v48, %v937_v62  ;;  %v958_v3 = vadd.f32 %v957_v63, %v951_v61 }
 0x126   : > { %v939_v4 = vrot.slane %v938_v1, 4  ;;  %v959_v5 = vadd.f32 %v958_v3, %v952_v0 }
 0x128   : > { %v940_v9 = vadd.f32 %v939_v4, %v938_v1  ;;  %v960_v10 = vrot.slane %v959_v5, 4 }
 0x12a   : > { %v941_v11 = vrot.slane %v940_v9, 2  ;;  %v961_v12 = vadd.f32 %v960_v10, %v959_v5 }
 0x12c   : > { %v942_v13 = vadd.f32 %v941_v11, %v940_v9  ;;  %v962_v14 = vrot.slane %v961_v12, 2 }
 0x12e   : > { %v943_v15 = vrot.slane %v942_v13, 1  ;;  %v963_v17 = vadd.f32 %v962_v14, %v961_v12 }
 0x130   : > { %v964_v18 = vrot.slane %v963_v17, 1  ;;  %v944_v19 = vadd.f32 %v943_v15, %v942_v13 }
 0x132   : > { %v965_v16 = vadd.f32 %v964_v18, %v963_v17 }
 0x134   : > { %v967_v20 = vsel %vm966_vm4, %v944_v19, %v965_v16 }
 0x135   : > { %968 = vst [vmem:[%s239_s14] sm:$0x3] %v967_v20 }
 0x136 PF: > { %s15_s15 = sadd.s32 1, %s1277_s15  }
 0x137   : > { %p12_p5 = scmp.ge.s32.totalorder %s15_s15, 4  }
 0x139   :  { %14 = sbr.rel (!%p12_p5) target bundleno = 1 (0x1), region = 80 }

</bundles_post_ra>
